<compile_context>
chip_gen: v5e
topology: v5e:2x2
jax: 0.10.0
libtpu: 0.0.40
codegen_flags: <defaults>
</compile_context>

<pallas_src>
import functools

import jax
import jax.numpy as jnp
from jax import lax
from jax.experimental import pallas as pl
from jax.experimental.pallas import tpu as pltpu


def transformer_kernel(x_ref, *rest, B, T, s_mem, num_heads):
    if s_mem > 0:
        mem_ref = rest[0]
        rest = rest[1:]
    else:
        mem_ref = None
    (wqkv_ref, bqkv_ref, wo_ref, w1_ref, b1_ref, w2_ref, vec_ref,
     out_ref, ent_ref) = rest

    E = x_ref.shape[-1]
    hd = E // num_heads
    scale = 1.0 / (hd ** 0.5)

    x = x_ref[...]                      # (B*T, E)
    wqkv = wqkv_ref[...]                # (E, 3E) = [Wq^T | Wk^T | Wv^T]
    bqkv = bqkv_ref[...]                # (1, 3E)

    # One fused projection for all B*T tokens; memory rows projected once, reused per batch.
    qkv_x = jnp.dot(x, wqkv, preferred_element_type=jnp.float32) + bqkv          # (B*T, 3E)
    if mem_ref is not None:
        qkv_m = (jnp.dot(mem_ref[...], wqkv, preferred_element_type=jnp.float32)
                 + bqkv)                                                          # (S_mem, 3E)

    dn = (((1,), (1,)), ((), ()))       # contract last dims: q @ k^T without explicit transpose

    attn_rows = []
    ent_b0 = None
    for b in range(B):
        r0 = b * T
        head_outs = []
        ent_heads = []
        for h in range(num_heads):
            cq, ck, cv = h * hd, E + h * hd, 2 * E + h * hd
            qh = qkv_x[r0:r0 + T, cq:cq + hd]                        # (T, hd)

            k_parts = []
            v_parts = []
            if mem_ref is not None:
                k_parts.append(qkv_m[:, ck:ck + hd])                 # (S_mem, hd)
                v_parts.append(qkv_m[:, cv:cv + hd])
            k_parts.append(qkv_x[r0:r0 + T, ck:ck + hd])             # (T, hd)
            v_parts.append(qkv_x[r0:r0 + T, cv:cv + hd])

            # split-softmax over [mem | x] keys (same values as softmax over the concat)
            s_parts = [lax.dot_general(qh, kp, dn,
                                       preferred_element_type=jnp.float32) * scale
                       for kp in k_parts]
            m = s_parts[0].max(axis=-1, keepdims=True)
            for sp in s_parts[1:]:
                m = jnp.maximum(m, sp.max(axis=-1, keepdims=True))
            p_parts = [jnp.exp(sp - m) for sp in s_parts]
            l = p_parts[0].sum(axis=-1, keepdims=True)
            for pp in p_parts[1:]:
                l = l + pp.sum(axis=-1, keepdims=True)
            inv_l = 1.0 / l                                          # (T, 1)

            pv = jnp.dot(p_parts[0], v_parts[0], preferred_element_type=jnp.float32)
            for pp, vp in zip(p_parts[1:], v_parts[1:]):
                pv = pv + jnp.dot(pp, vp, preferred_element_type=jnp.float32)
            head_outs.append(pv * inv_l)                             # normalize after P@V

            if b == 0:
                # -(p*log p).sum() == log(l) - sum(p_unnorm*(s-m)) / l   (one log per row)
                ps = jnp.sum(p_parts[0] * (s_parts[0] - m), axis=-1, keepdims=True)
                for pp, sp in zip(p_parts[1:], s_parts[1:]):
                    ps = ps + jnp.sum(pp * (sp - m), axis=-1, keepdims=True)
                ent_heads.append(jnp.log(l) - ps * inv_l)            # (T, 1)

        attn_rows.append(jnp.concatenate(head_outs, axis=-1))        # (T, E)
        if b == 0:
            ent_b0 = ent_heads[0]
            for e in ent_heads[1:]:
                ent_b0 = jnp.maximum(ent_b0, e)                      # max over heads

    attn = jnp.concatenate(attn_rows, axis=0)                        # (B*T, E)

    vec = vec_ref[...]                                               # (8, E) packed vectors
    bo, g1, beta1 = vec[0:1, :], vec[1:2, :], vec[2:3, :]
    b2, g2, beta2 = vec[3:4, :], vec[4:5, :], vec[5:6, :]

    def layernorm(z, g, bta):
        mu = jnp.mean(z, axis=-1, keepdims=True)
        zc = z - mu
        var = jnp.mean(zc * zc, axis=-1, keepdims=True)
        return zc * lax.rsqrt(var + 1e-5) * g + bta

    attn = jnp.dot(attn, wo_ref[...], preferred_element_type=jnp.float32) + bo
    x2 = layernorm(attn, g1, beta1)
    h1 = jnp.maximum(
        jnp.dot(x2, w1_ref[...], preferred_element_type=jnp.float32) + b1_ref[...], 0.0)
    ff = jnp.dot(h1, w2_ref[...], preferred_element_type=jnp.float32) + b2
    out = layernorm(ff, g2, beta2)

    out_ref[...] = out.astype(out_ref.dtype)
    ent_ref[...] = ent_b0.astype(ent_ref.dtype)


def attention_ff_fused(x, mem, params, num_heads):
    """One fused kernel call over all batches.

    Returns (out (B,T,E), ent_tok (T,)) where ent_tok is the per-token attention entropy of
    batch 0, already max-reduced over heads (the only thing the module's memory update uses).
    """
    B, T, E = x.shape
    s_mem = 0 if mem is None else mem.shape[0]
    x2d = x.reshape(B * T, E)

    args = [x2d]
    if mem is not None:
        args.append(mem)
    args += [params["wqkv"], params["bqkv"], params["wo_t"],
             params["w1_t"], params["b1"], params["w2_t"], params["vecs"]]

    def full_spec(shape):
        nd = len(shape)
        return pl.BlockSpec(shape, lambda i, _nd=nd: (0,) * _nd)

    in_specs = [full_spec(a.shape) for a in args]
    out_specs = (full_spec((B * T, E)), full_spec((T, 1)))
    out_shape = (jax.ShapeDtypeStruct((B * T, E), jnp.float32),
                 jax.ShapeDtypeStruct((T, 1), jnp.float32))

    kernel = functools.partial(transformer_kernel, B=B, T=T, s_mem=s_mem,
                               num_heads=num_heads)
    out2d, ent = pl.pallas_call(
        kernel,
        out_shape=out_shape,
        grid=(1,),
        in_specs=in_specs,
        out_specs=out_specs,
        compiler_params=pltpu.CompilerParams(dimension_semantics=("arbitrary",)),
    )(*args)
    return out2d.reshape(B, T, E), ent[:, 0]


def layer_forward(params, x, mem_x, mem_ent, mem_size, num_heads):
    """Mirrors ImprovedMemoryTransformerLayerNoRes.forward."""
    eps = 1e-10

    out, ent_tok = attention_ff_fused(x, mem_x, params, num_heads)   # ent_tok: (T,)
    x_det = jax.lax.stop_gradient(x[0])                              # (T, E)

    if mem_x is None:
        mem_x_new, mem_ent_new = x_det, ent_tok
    else:
        mem_x_new = jnp.concatenate([mem_x, x_det], axis=0)
        mem_ent_new = jnp.concatenate([mem_ent, ent_tok], axis=0)

    if mem_x_new.shape[0] > mem_size:
        total_ent = jnp.sum(mem_ent_new) + eps
        kept_vals, idx = jax.lax.top_k(mem_ent_new, mem_size)
        ratio = jnp.sum(kept_vals) / total_ent
        mem_x_new = mem_x_new[idx]
        mem_ent_new = kept_vals
    else:
        ratio = jnp.float32(1.0)

    return out, mem_x_new, mem_ent_new, ratio


def init_params(key, E):
    """Deterministic synthetic parameters; shapes follow the PyTorch module, packed for the
    fused kernel (QKV weights fused to (E,3E), small vectors packed into one (8,E) slab)."""
    ks = jax.random.split(key, 8)
    s = 0.02
    wq_t = jax.random.normal(ks[0], (E, E), jnp.float32) * s
    wk_t = jax.random.normal(ks[1], (E, E), jnp.float32) * s
    wv_t = jax.random.normal(ks[2], (E, E), jnp.float32) * s
    wo_t = jax.random.normal(ks[3], (E, E), jnp.float32) * s
    w1_t = jax.random.normal(ks[4], (E, 4 * E), jnp.float32) * s
    b1 = jax.random.normal(ks[5], (1, 4 * E), jnp.float32) * s
    w2_t = jax.random.normal(ks[6], (4 * E, E), jnp.float32) * s
    b2 = jax.random.normal(ks[7], (1, E), jnp.float32) * s

    zeros = jnp.zeros((1, E), jnp.float32)
    ones = jnp.ones((1, E), jnp.float32)
    bq = bk = bv = zeros
    bo, g1, beta1, g2, beta2 = zeros, ones, zeros, ones, zeros

    return {
        "wqkv": jnp.concatenate([wq_t, wk_t, wv_t], axis=1),          # (E, 3E)
        "bqkv": jnp.concatenate([bq, bk, bv], axis=1),                # (1, 3E)
        "wo_t": wo_t,                                                 # (E, E)
        "w1_t": w1_t,                                                 # (E, 4E)
        "b1": b1,                                                     # (1, 4E)
        "w2_t": w2_t,                                                 # (4E, E)
        "vecs": jnp.concatenate(
            [bo, g1, beta1, b2, g2, beta2, jnp.zeros((2, E), jnp.float32)], axis=0),  # (8, E)
    }


if __name__ == "__main__":
    embed_dim = 32
    num_heads = 2
    mem_size = 50
    B, T = 2, 8

    key = jax.random.PRNGKey(0)
    k_x, k_p, k_m, k_e = jax.random.split(key, 4)
    params = init_params(k_p, embed_dim)
    x = jax.random.normal(k_x, (B, T, embed_dim), jnp.float32)

    # Case 1: no memory yet (k = v = x branch).
    out1, mem_x1, mem_ent1, ratio1 = layer_forward(
        params, x, None, None, mem_size, num_heads)

    # Case 2: full memory (shared memory rows + top-k eviction branch).
    mem_x = jax.random.normal(k_m, (mem_size, embed_dim), jnp.float32)
    mem_ent = jax.nn.softplus(jax.random.normal(k_e, (mem_size,), jnp.float32))
    out2, mem_x2, mem_ent2, ratio2 = layer_forward(
        params, x, mem_x, mem_ent, mem_size, num_heads)

    for r in (out1, mem_x1, mem_ent1, ratio1, out2, mem_x2, mem_ent2, ratio2):
        jax.block_until_ready(r)

    assert out1.shape == (B, T, embed_dim)
    assert out2.shape == (B, T, embed_dim)
    assert mem_x1.shape == (T, embed_dim)
    assert mem_ent1.shape == (T,)
    assert mem_x2.shape == (mem_size, embed_dim)
    assert mem_ent2.shape == (mem_size,)
    print("KERNEL_OK")
</pallas_src>

<mosaic_0001>
module attributes {stable_mosaic.version = 11 : i64} {
  func.func @transformer_kernel(%arg0: i32, %arg1: memref<16x32xf32, #tpu.memory_space<vmem>>, %arg2: memref<32x96xf32, #tpu.memory_space<vmem>>, %arg3: memref<1x96xf32, #tpu.memory_space<vmem>>, %arg4: memref<32x32xf32, #tpu.memory_space<vmem>>, %arg5: memref<32x128xf32, #tpu.memory_space<vmem>>, %arg6: memref<1x128xf32, #tpu.memory_space<vmem>>, %arg7: memref<128x32xf32, #tpu.memory_space<vmem>>, %arg8: memref<8x32xf32, #tpu.memory_space<vmem>>, %arg9: memref<16x32xf32, #tpu.memory_space<vmem>>, %arg10: memref<8x1xf32, #tpu.memory_space<vmem>>) attributes {dimension_semantics = [#tpu.dimension_semantics<arbitrary>], iteration_bounds = array<i64: 1>, scalar_prefetch = 0 : i64, scratch_operands = 0 : i64, tpu.core_type = #tpu.core_type<tc>, window_params = [{pipeline_mode = #tpu.pipeline_mode<synchronous>, transform_indices = @transform_0, window_bounds = array<i64: 16, 32>}, {pipeline_mode = #tpu.pipeline_mode<synchronous>, transform_indices = @transform_1, window_bounds = array<i64: 32, 96>}, {pipeline_mode = #tpu.pipeline_mode<synchronous>, transform_indices = @transform_2, window_bounds = array<i64: 1, 96>}, {pipeline_mode = #tpu.pipeline_mode<synchronous>, transform_indices = @transform_3, window_bounds = array<i64: 32, 32>}, {pipeline_mode = #tpu.pipeline_mode<synchronous>, transform_indices = @transform_4, window_bounds = array<i64: 32, 128>}, {pipeline_mode = #tpu.pipeline_mode<synchronous>, transform_indices = @transform_5, window_bounds = array<i64: 1, 128>}, {pipeline_mode = #tpu.pipeline_mode<synchronous>, transform_indices = @transform_6, window_bounds = array<i64: 128, 32>}, {pipeline_mode = #tpu.pipeline_mode<synchronous>, transform_indices = @transform_7, window_bounds = array<i64: 8, 32>}, {pipeline_mode = #tpu.pipeline_mode<synchronous>, transform_indices = @transform_8, window_bounds = array<i64: 16, 32>}, {pipeline_mode = #tpu.pipeline_mode<synchronous>, transform_indices = @transform_9, window_bounds = array<i64: 8, 1>}]} {
    %c0 = arith.constant 0 : index
    %c0_0 = arith.constant 0 : index
    %0 = vector.load %arg1[%c0, %c0_0] : memref<16x32xf32, #tpu.memory_space<vmem>>, vector<16x32xf32>
    %c0_1 = arith.constant 0 : index
    %c0_2 = arith.constant 0 : index
    %1 = vector.load %arg2[%c0_1, %c0_2] : memref<32x96xf32, #tpu.memory_space<vmem>>, vector<32x96xf32>
    %c0_3 = arith.constant 0 : index
    %c0_4 = arith.constant 0 : index
    %2 = vector.load %arg3[%c0_3, %c0_4] : memref<1x96xf32, #tpu.memory_space<vmem>>, vector<1x96xf32>
    %cst = arith.constant dense<0.000000e+00> : vector<16x96xf32>
    %3 = tpu.matmul %0, %1, %cst {dimension_numbers = #tpu.dot_dimension_numbers<[1], [0], [0], [1], [0, 0, 1, 1], [], []>} : vector<16x32xf32>, vector<32x96xf32>, vector<16x96xf32> -> vector<16x96xf32>
    %4 = vector.broadcast %2 : vector<1x96xf32> to vector<16x96xf32>
    %5 = arith.addf %3, %4 : vector<16x96xf32>
    %6 = vector.extract_strided_slice %5 {offsets = [0, 0], sizes = [8, 16], strides = [1, 1]} : vector<16x96xf32> to vector<8x16xf32>
    %7 = vector.extract_strided_slice %5 {offsets = [0, 32], sizes = [8, 16], strides = [1, 1]} : vector<16x96xf32> to vector<8x16xf32>
    %8 = vector.extract_strided_slice %5 {offsets = [0, 64], sizes = [8, 16], strides = [1, 1]} : vector<16x96xf32> to vector<8x16xf32>
    %cst_5 = arith.constant dense<0.000000e+00> : vector<8x8xf32>
    %9 = tpu.matmul %6, %7, %cst_5 {dimension_numbers = #tpu.dot_dimension_numbers<[1], [1], [0], [0], [0, 0, 1, 0], [], []>} : vector<8x16xf32>, vector<8x16xf32>, vector<8x8xf32> -> vector<8x8xf32>
    %cst_6 = arith.constant 2.500000e-01 : f32
    %10 = vector.broadcast %cst_6 : f32 to vector<8x8xf32>
    %11 = arith.mulf %9, %10 : vector<8x8xf32>
    %cst_7 = arith.constant dense<0xFF800000> : vector<8xf32>
    %12 = vector.multi_reduction <maximumf>, %11, %cst_7 [1] : vector<8x8xf32> to vector<8xf32>
    %13 = vector.shape_cast %12 : vector<8xf32> to vector<8x1xf32>
    %14 = vector.broadcast %13 : vector<8x1xf32> to vector<8x8xf32>
    %15 = arith.subf %11, %14 : vector<8x8xf32>
    %16 = math.exp %15 : vector<8x8xf32>
    %cst_8 = arith.constant dense<0.000000e+00> : vector<8xf32>
    %17 = vector.multi_reduction <add>, %16, %cst_8 [1] : vector<8x8xf32> to vector<8xf32>
    %18 = vector.shape_cast %17 : vector<8xf32> to vector<8x1xf32>
    %cst_9 = arith.constant 1.000000e+00 : f32
    %19 = vector.broadcast %cst_9 : f32 to vector<8x1xf32>
    %20 = arith.divf %19, %18 : vector<8x1xf32>
    %cst_10 = arith.constant dense<0.000000e+00> : vector<8x16xf32>
    %21 = tpu.matmul %16, %8, %cst_10 {dimension_numbers = #tpu.dot_dimension_numbers<[1], [0], [0], [1], [0, 0, 1, 1], [], []>} : vector<8x8xf32>, vector<8x16xf32>, vector<8x16xf32> -> vector<8x16xf32>
    %22 = vector.broadcast %20 : vector<8x1xf32> to vector<8x16xf32>
    %23 = arith.mulf %21, %22 : vector<8x16xf32>
    %24 = vector.broadcast %13 : vector<8x1xf32> to vector<8x8xf32>
    %25 = arith.subf %11, %24 : vector<8x8xf32>
    %26 = arith.mulf %16, %25 : vector<8x8xf32>
    %cst_11 = arith.constant dense<0.000000e+00> : vector<8xf32>
    %27 = vector.multi_reduction <add>, %26, %cst_11 [1] : vector<8x8xf32> to vector<8xf32>
    %28 = vector.shape_cast %27 : vector<8xf32> to vector<8x1xf32>
    %29 = math.log %18 : vector<8x1xf32>
    %30 = arith.mulf %28, %20 : vector<8x1xf32>
    %31 = arith.subf %29, %30 : vector<8x1xf32>
    %32 = vector.extract_strided_slice %5 {offsets = [0, 16], sizes = [8, 16], strides = [1, 1]} : vector<16x96xf32> to vector<8x16xf32>
    %33 = vector.extract_strided_slice %5 {offsets = [0, 48], sizes = [8, 16], strides = [1, 1]} : vector<16x96xf32> to vector<8x16xf32>
    %34 = vector.extract_strided_slice %5 {offsets = [0, 80], sizes = [8, 16], strides = [1, 1]} : vector<16x96xf32> to vector<8x16xf32>
    %cst_12 = arith.constant dense<0.000000e+00> : vector<8x8xf32>
    %35 = tpu.matmul %32, %33, %cst_12 {dimension_numbers = #tpu.dot_dimension_numbers<[1], [1], [0], [0], [0, 0, 1, 0], [], []>} : vector<8x16xf32>, vector<8x16xf32>, vector<8x8xf32> -> vector<8x8xf32>
    %cst_13 = arith.constant 2.500000e-01 : f32
    %36 = vector.broadcast %cst_13 : f32 to vector<8x8xf32>
    %37 = arith.mulf %35, %36 : vector<8x8xf32>
    %cst_14 = arith.constant dense<0xFF800000> : vector<8xf32>
    %38 = vector.multi_reduction <maximumf>, %37, %cst_14 [1] : vector<8x8xf32> to vector<8xf32>
    %39 = vector.shape_cast %38 : vector<8xf32> to vector<8x1xf32>
    %40 = vector.broadcast %39 : vector<8x1xf32> to vector<8x8xf32>
    %41 = arith.subf %37, %40 : vector<8x8xf32>
    %42 = math.exp %41 : vector<8x8xf32>
    %cst_15 = arith.constant dense<0.000000e+00> : vector<8xf32>
    %43 = vector.multi_reduction <add>, %42, %cst_15 [1] : vector<8x8xf32> to vector<8xf32>
    %44 = vector.shape_cast %43 : vector<8xf32> to vector<8x1xf32>
    %cst_16 = arith.constant 1.000000e+00 : f32
    %45 = vector.broadcast %cst_16 : f32 to vector<8x1xf32>
    %46 = arith.divf %45, %44 : vector<8x1xf32>
    %cst_17 = arith.constant dense<0.000000e+00> : vector<8x16xf32>
    %47 = tpu.matmul %42, %34, %cst_17 {dimension_numbers = #tpu.dot_dimension_numbers<[1], [0], [0], [1], [0, 0, 1, 1], [], []>} : vector<8x8xf32>, vector<8x16xf32>, vector<8x16xf32> -> vector<8x16xf32>
    %48 = vector.broadcast %46 : vector<8x1xf32> to vector<8x16xf32>
    %49 = arith.mulf %47, %48 : vector<8x16xf32>
    %50 = vector.broadcast %39 : vector<8x1xf32> to vector<8x8xf32>
    %51 = arith.subf %37, %50 : vector<8x8xf32>
    %52 = arith.mulf %42, %51 : vector<8x8xf32>
    %cst_18 = arith.constant dense<0.000000e+00> : vector<8xf32>
    %53 = vector.multi_reduction <add>, %52, %cst_18 [1] : vector<8x8xf32> to vector<8xf32>
    %54 = vector.shape_cast %53 : vector<8xf32> to vector<8x1xf32>
    %55 = math.log %44 : vector<8x1xf32>
    %56 = arith.mulf %54, %46 : vector<8x1xf32>
    %57 = arith.subf %55, %56 : vector<8x1xf32>
    %58 = tpu.concatenate %23, %49 in 1 : vector<8x16xf32>, vector<8x16xf32> -> vector<8x32xf32>
    %59 = arith.maximumf %31, %57 : vector<8x1xf32>
    %60 = vector.extract_strided_slice %5 {offsets = [8, 0], sizes = [8, 16], strides = [1, 1]} : vector<16x96xf32> to vector<8x16xf32>
    %61 = vector.extract_strided_slice %5 {offsets = [8, 32], sizes = [8, 16], strides = [1, 1]} : vector<16x96xf32> to vector<8x16xf32>
    %62 = vector.extract_strided_slice %5 {offsets = [8, 64], sizes = [8, 16], strides = [1, 1]} : vector<16x96xf32> to vector<8x16xf32>
    %cst_19 = arith.constant dense<0.000000e+00> : vector<8x8xf32>
    %63 = tpu.matmul %60, %61, %cst_19 {dimension_numbers = #tpu.dot_dimension_numbers<[1], [1], [0], [0], [0, 0, 1, 0], [], []>} : vector<8x16xf32>, vector<8x16xf32>, vector<8x8xf32> -> vector<8x8xf32>
    %cst_20 = arith.constant 2.500000e-01 : f32
    %64 = vector.broadcast %cst_20 : f32 to vector<8x8xf32>
    %65 = arith.mulf %63, %64 : vector<8x8xf32>
    %cst_21 = arith.constant dense<0xFF800000> : vector<8xf32>
    %66 = vector.multi_reduction <maximumf>, %65, %cst_21 [1] : vector<8x8xf32> to vector<8xf32>
    %67 = vector.shape_cast %66 : vector<8xf32> to vector<8x1xf32>
    %68 = vector.broadcast %67 : vector<8x1xf32> to vector<8x8xf32>
    %69 = arith.subf %65, %68 : vector<8x8xf32>
    %70 = math.exp %69 : vector<8x8xf32>
    %cst_22 = arith.constant dense<0.000000e+00> : vector<8xf32>
    %71 = vector.multi_reduction <add>, %70, %cst_22 [1] : vector<8x8xf32> to vector<8xf32>
    %72 = vector.shape_cast %71 : vector<8xf32> to vector<8x1xf32>
    %cst_23 = arith.constant 1.000000e+00 : f32
    %73 = vector.broadcast %cst_23 : f32 to vector<8x1xf32>
    %74 = arith.divf %73, %72 : vector<8x1xf32>
    %cst_24 = arith.constant dense<0.000000e+00> : vector<8x16xf32>
    %75 = tpu.matmul %70, %62, %cst_24 {dimension_numbers = #tpu.dot_dimension_numbers<[1], [0], [0], [1], [0, 0, 1, 1], [], []>} : vector<8x8xf32>, vector<8x16xf32>, vector<8x16xf32> -> vector<8x16xf32>
    %76 = vector.broadcast %74 : vector<8x1xf32> to vector<8x16xf32>
    %77 = arith.mulf %75, %76 : vector<8x16xf32>
    %78 = vector.extract_strided_slice %5 {offsets = [8, 16], sizes = [8, 16], strides = [1, 1]} : vector<16x96xf32> to vector<8x16xf32>
    %79 = vector.extract_strided_slice %5 {offsets = [8, 48], sizes = [8, 16], strides = [1, 1]} : vector<16x96xf32> to vector<8x16xf32>
    %80 = vector.extract_strided_slice %5 {offsets = [8, 80], sizes = [8, 16], strides = [1, 1]} : vector<16x96xf32> to vector<8x16xf32>
    %cst_25 = arith.constant dense<0.000000e+00> : vector<8x8xf32>
    %81 = tpu.matmul %78, %79, %cst_25 {dimension_numbers = #tpu.dot_dimension_numbers<[1], [1], [0], [0], [0, 0, 1, 0], [], []>} : vector<8x16xf32>, vector<8x16xf32>, vector<8x8xf32> -> vector<8x8xf32>
    %cst_26 = arith.constant 2.500000e-01 : f32
    %82 = vector.broadcast %cst_26 : f32 to vector<8x8xf32>
    %83 = arith.mulf %81, %82 : vector<8x8xf32>
    %cst_27 = arith.constant dense<0xFF800000> : vector<8xf32>
    %84 = vector.multi_reduction <maximumf>, %83, %cst_27 [1] : vector<8x8xf32> to vector<8xf32>
    %85 = vector.shape_cast %84 : vector<8xf32> to vector<8x1xf32>
    %86 = vector.broadcast %85 : vector<8x1xf32> to vector<8x8xf32>
    %87 = arith.subf %83, %86 : vector<8x8xf32>
    %88 = math.exp %87 : vector<8x8xf32>
    %cst_28 = arith.constant dense<0.000000e+00> : vector<8xf32>
    %89 = vector.multi_reduction <add>, %88, %cst_28 [1] : vector<8x8xf32> to vector<8xf32>
    %90 = vector.shape_cast %89 : vector<8xf32> to vector<8x1xf32>
    %cst_29 = arith.constant 1.000000e+00 : f32
    %91 = vector.broadcast %cst_29 : f32 to vector<8x1xf32>
    %92 = arith.divf %91, %90 : vector<8x1xf32>
    %cst_30 = arith.constant dense<0.000000e+00> : vector<8x16xf32>
    %93 = tpu.matmul %88, %80, %cst_30 {dimension_numbers = #tpu.dot_dimension_numbers<[1], [0], [0], [1], [0, 0, 1, 1], [], []>} : vector<8x8xf32>, vector<8x16xf32>, vector<8x16xf32> -> vector<8x16xf32>
    %94 = vector.broadcast %92 : vector<8x1xf32> to vector<8x16xf32>
    %95 = arith.mulf %93, %94 : vector<8x16xf32>
    %96 = tpu.concatenate %77, %95 in 1 : vector<8x16xf32>, vector<8x16xf32> -> vector<8x32xf32>
    %97 = tpu.concatenate %58, %96 in 0 : vector<8x32xf32>, vector<8x32xf32> -> vector<16x32xf32>
    %c0_31 = arith.constant 0 : index
    %c0_32 = arith.constant 0 : index
    %98 = vector.load %arg8[%c0_31, %c0_32] : memref<8x32xf32, #tpu.memory_space<vmem>>, vector<8x32xf32>
    %99 = vector.extract_strided_slice %98 {offsets = [0, 0], sizes = [1, 32], strides = [1, 1]} : vector<8x32xf32> to vector<1x32xf32>
    %100 = vector.extract_strided_slice %98 {offsets = [1, 0], sizes = [1, 32], strides = [1, 1]} : vector<8x32xf32> to vector<1x32xf32>
    %101 = vector.extract_strided_slice %98 {offsets = [2, 0], sizes = [1, 32], strides = [1, 1]} : vector<8x32xf32> to vector<1x32xf32>
    %102 = vector.extract_strided_slice %98 {offsets = [3, 0], sizes = [1, 32], strides = [1, 1]} : vector<8x32xf32> to vector<1x32xf32>
    %103 = vector.extract_strided_slice %98 {offsets = [4, 0], sizes = [1, 32], strides = [1, 1]} : vector<8x32xf32> to vector<1x32xf32>
    %104 = vector.extract_strided_slice %98 {offsets = [5, 0], sizes = [1, 32], strides = [1, 1]} : vector<8x32xf32> to vector<1x32xf32>
    %c0_33 = arith.constant 0 : index
    %c0_34 = arith.constant 0 : index
    %105 = vector.load %arg4[%c0_33, %c0_34] : memref<32x32xf32, #tpu.memory_space<vmem>>, vector<32x32xf32>
    %cst_35 = arith.constant dense<0.000000e+00> : vector<16x32xf32>
    %106 = tpu.matmul %97, %105, %cst_35 {dimension_numbers = #tpu.dot_dimension_numbers<[1], [0], [0], [1], [0, 0, 1, 1], [], []>} : vector<16x32xf32>, vector<32x32xf32>, vector<16x32xf32> -> vector<16x32xf32>
    %107 = vector.broadcast %99 : vector<1x32xf32> to vector<16x32xf32>
    %108 = arith.addf %106, %107 : vector<16x32xf32>
    %cst_36 = arith.constant dense<0.000000e+00> : vector<16xf32>
    %109 = vector.multi_reduction <add>, %108, %cst_36 [1] : vector<16x32xf32> to vector<16xf32>
    %110 = vector.shape_cast %109 : vector<16xf32> to vector<16x1xf32>
    %cst_37 = arith.constant 3.200000e+01 : f32
    %111 = vector.broadcast %cst_37 : f32 to vector<16x1xf32>
    %112 = arith.divf %110, %111 : vector<16x1xf32>
    %113 = vector.broadcast %112 : vector<16x1xf32> to vector<16x32xf32>
    %114 = arith.subf %108, %113 : vector<16x32xf32>
    %115 = arith.mulf %114, %114 : vector<16x32xf32>
    %cst_38 = arith.constant dense<0.000000e+00> : vector<16xf32>
    %116 = vector.multi_reduction <add>, %115, %cst_38 [1] : vector<16x32xf32> to vector<16xf32>
    %117 = vector.shape_cast %116 : vector<16xf32> to vector<16x1xf32>
    %cst_39 = arith.constant 3.200000e+01 : f32
    %118 = vector.broadcast %cst_39 : f32 to vector<16x1xf32>
    %119 = arith.divf %117, %118 : vector<16x1xf32>
    %cst_40 = arith.constant 9.99999974E-6 : f32
    %120 = vector.broadcast %cst_40 : f32 to vector<16x1xf32>
    %121 = arith.addf %119, %120 : vector<16x1xf32>
    %122 = math.rsqrt %121 : vector<16x1xf32>
    %123 = vector.broadcast %122 : vector<16x1xf32> to vector<16x32xf32>
    %124 = arith.mulf %114, %123 : vector<16x32xf32>
    %125 = vector.broadcast %100 : vector<1x32xf32> to vector<16x32xf32>
    %126 = arith.mulf %124, %125 : vector<16x32xf32>
    %127 = vector.broadcast %101 : vector<1x32xf32> to vector<16x32xf32>
    %128 = arith.addf %126, %127 : vector<16x32xf32>
    %c0_41 = arith.constant 0 : index
    %c0_42 = arith.constant 0 : index
    %129 = vector.load %arg5[%c0_41, %c0_42] : memref<32x128xf32, #tpu.memory_space<vmem>>, vector<32x128xf32>
    %cst_43 = arith.constant dense<0.000000e+00> : vector<16x128xf32>
    %130 = tpu.matmul %128, %129, %cst_43 {dimension_numbers = #tpu.dot_dimension_numbers<[1], [0], [0], [1], [0, 0, 1, 1], [], []>} : vector<16x32xf32>, vector<32x128xf32>, vector<16x128xf32> -> vector<16x128xf32>
    %c0_44 = arith.constant 0 : index
    %c0_45 = arith.constant 0 : index
    %131 = vector.load %arg6[%c0_44, %c0_45] : memref<1x128xf32, #tpu.memory_space<vmem>>, vector<1x128xf32>
    %132 = vector.broadcast %131 : vector<1x128xf32> to vector<16x128xf32>
    %133 = arith.addf %130, %132 : vector<16x128xf32>
    %cst_46 = arith.constant 0.000000e+00 : f32
    %134 = vector.broadcast %cst_46 : f32 to vector<16x128xf32>
    %135 = arith.maximumf %133, %134 : vector<16x128xf32>
    %c0_47 = arith.constant 0 : index
    %c0_48 = arith.constant 0 : index
    %136 = vector.load %arg7[%c0_47, %c0_48] : memref<128x32xf32, #tpu.memory_space<vmem>>, vector<128x32xf32>
    %cst_49 = arith.constant dense<0.000000e+00> : vector<16x32xf32>
    %137 = tpu.matmul %135, %136, %cst_49 {dimension_numbers = #tpu.dot_dimension_numbers<[1], [0], [0], [1], [0, 0, 1, 1], [], []>} : vector<16x128xf32>, vector<128x32xf32>, vector<16x32xf32> -> vector<16x32xf32>
    %138 = vector.broadcast %102 : vector<1x32xf32> to vector<16x32xf32>
    %139 = arith.addf %137, %138 : vector<16x32xf32>
    %cst_50 = arith.constant dense<0.000000e+00> : vector<16xf32>
    %140 = vector.multi_reduction <add>, %139, %cst_50 [1] : vector<16x32xf32> to vector<16xf32>
    %141 = vector.shape_cast %140 : vector<16xf32> to vector<16x1xf32>
    %cst_51 = arith.constant 3.200000e+01 : f32
    %142 = vector.broadcast %cst_51 : f32 to vector<16x1xf32>
    %143 = arith.divf %141, %142 : vector<16x1xf32>
    %144 = vector.broadcast %143 : vector<16x1xf32> to vector<16x32xf32>
    %145 = arith.subf %139, %144 : vector<16x32xf32>
    %146 = arith.mulf %145, %145 : vector<16x32xf32>
    %cst_52 = arith.constant dense<0.000000e+00> : vector<16xf32>
    %147 = vector.multi_reduction <add>, %146, %cst_52 [1] : vector<16x32xf32> to vector<16xf32>
    %148 = vector.shape_cast %147 : vector<16xf32> to vector<16x1xf32>
    %cst_53 = arith.constant 3.200000e+01 : f32
    %149 = vector.broadcast %cst_53 : f32 to vector<16x1xf32>
    %150 = arith.divf %148, %149 : vector<16x1xf32>
    %cst_54 = arith.constant 9.99999974E-6 : f32
    %151 = vector.broadcast %cst_54 : f32 to vector<16x1xf32>
    %152 = arith.addf %150, %151 : vector<16x1xf32>
    %153 = math.rsqrt %152 : vector<16x1xf32>
    %154 = vector.broadcast %153 : vector<16x1xf32> to vector<16x32xf32>
    %155 = arith.mulf %145, %154 : vector<16x32xf32>
    %156 = vector.broadcast %103 : vector<1x32xf32> to vector<16x32xf32>
    %157 = arith.mulf %155, %156 : vector<16x32xf32>
    %158 = vector.broadcast %104 : vector<1x32xf32> to vector<16x32xf32>
    %159 = arith.addf %157, %158 : vector<16x32xf32>
    %c0_55 = arith.constant 0 : index
    %c0_56 = arith.constant 0 : index
    %160 = vector.load %arg9[%c0_55, %c0_56] : memref<16x32xf32, #tpu.memory_space<vmem>>, vector<16x32xf32>
    tpu.vector_store %arg9[%c0_55, %c0_56], %159 {strides = array<i32>} : memref<16x32xf32, #tpu.memory_space<vmem>>, vector<16x32xf32>,
    %c0_57 = arith.constant 0 : index
    %c0_58 = arith.constant 0 : index
    %161 = vector.load %arg10[%c0_57, %c0_58] : memref<8x1xf32, #tpu.memory_space<vmem>>, vector<8x1xf32>
    tpu.vector_store %arg10[%c0_57, %c0_58], %59 {strides = array<i32>} : memref<8x1xf32, #tpu.memory_space<vmem>>, vector<8x1xf32>,
    return
  }
  func.func @transform_0(%arg0: i32) -> (i32, i32) {
    %c0_i32 = arith.constant 0 : i32
    %c0_i32_0 = arith.constant 0 : i32
    %c0_i32_1 = arith.constant 0 : i32
    return %c0_i32, %c0_i32_0 : i32, i32
  }
  func.func @transform_1(%arg0: i32) -> (i32, i32) {
    %c0_i32 = arith.constant 0 : i32
    %c0_i32_0 = arith.constant 0 : i32
    %c0_i32_1 = arith.constant 0 : i32
    return %c0_i32, %c0_i32_0 : i32, i32
  }
  func.func @transform_2(%arg0: i32) -> (i32, i32) {
    %c0_i32 = arith.constant 0 : i32
    %c0_i32_0 = arith.constant 0 : i32
    %c0_i32_1 = arith.constant 0 : i32
    return %c0_i32, %c0_i32_0 : i32, i32
  }
  func.func @transform_3(%arg0: i32) -> (i32, i32) {
    %c0_i32 = arith.constant 0 : i32
    %c0_i32_0 = arith.constant 0 : i32
    %c0_i32_1 = arith.constant 0 : i32
    return %c0_i32, %c0_i32_0 : i32, i32
  }
  func.func @transform_4(%arg0: i32) -> (i32, i32) {
    %c0_i32 = arith.constant 0 : i32
    %c0_i32_0 = arith.constant 0 : i32
    %c0_i32_1 = arith.constant 0 : i32
    return %c0_i32, %c0_i32_0 : i32, i32
  }
  func.func @transform_5(%arg0: i32) -> (i32, i32) {
    %c0_i32 = arith.constant 0 : i32
    %c0_i32_0 = arith.constant 0 : i32
    %c0_i32_1 = arith.constant 0 : i32
    return %c0_i32, %c0_i32_0 : i32, i32
  }
  func.func @transform_6(%arg0: i32) -> (i32, i32) {
    %c0_i32 = arith.constant 0 : i32
    %c0_i32_0 = arith.constant 0 : i32
    %c0_i32_1 = arith.constant 0 : i32
    return %c0_i32, %c0_i32_0 : i32, i32
  }
  func.func @transform_7(%arg0: i32) -> (i32, i32) {
    %c0_i32 = arith.constant 0 : i32
    %c0_i32_0 = arith.constant 0 : i32
    %c0_i32_1 = arith.constant 0 : i32
    return %c0_i32, %c0_i32_0 : i32, i32
  }
  func.func @transform_8(%arg0: i32) -> (i32, i32) {
    %c0_i32 = arith.constant 0 : i32
    %c0_i32_0 = arith.constant 0 : i32
    %c0_i32_1 = arith.constant 0 : i32
    return %c0_i32, %c0_i32_0 : i32, i32
  }
  func.func @transform_9(%arg0: i32) -> (i32, i32) {
    %c0_i32 = arith.constant 0 : i32
    %c0_i32_0 = arith.constant 0 : i32
    %c0_i32_1 = arith.constant 0 : i32
    return %c0_i32, %c0_i32_0 : i32, i32
  }
}

</mosaic_0001>

<bundles_post_ra>
// kernel: tpu_custom_call.1
= control target key start
LH: loop header
LB: loop body
LE: loop exit
PB: predicated region body
PF: predicated region fallthrough
CT: control target
= control target key end

     0   :  { %s1017_s0 = inlined_call_operand.vmem [shape: f32[16,32], index: 0, kind: input, shape index: {}]   ;;  %s1018_s1 = inlined_call_operand.vmem [shape: f32[32,96], index: 1, kind: input, shape index: {}]   ;;  %s1019_s2 = inlined_call_operand.vmem [shape: f32[1,96], index: 2, kind: input, shape index: {}]   ;;  %s1020_s3 = inlined_call_operand.vmem [shape: f32[32,32], index: 3, kind: input, shape index: {}]   ;;  %s1021_s4 = inlined_call_operand.vmem [shape: f32[32,128], index: 4, kind: input, shape index: {}]   ;;  %s1022_s5 = inlined_call_operand.vmem [shape: f32[1,128], index: 5, kind: input, shape index: {}]   ;;  %s1023_s6 = inlined_call_operand.vmem [shape: f32[128,32], index: 6, kind: input, shape index: {}]   ;;  %s1024_s7 = inlined_call_operand.vmem [shape: f32[8,32], index: 7, kind: input, shape index: {}]   ;;  %s1025_s8 = inlined_call_operand.hbm [shape: f32[16,32], index: 8, kind: output, shape index: {0}]   ;;  %s1026_s9 = inlined_call_operand.vmem [shape: f32[8,1], index: 9, kind: output, shape index: {1}]  }
   0x1   :  { %v37_v0 = vld [vmem:[%s1018_s1 + $0x18] sm:$0xff]  ;;  %v36_v1 = vld [vmem:[%s1018_s1 + $0x10] sm:$0xff]  ;;  %v35_v2 = vld [vmem:[%s1018_s1 + $0x8] sm:$0xff] }
   0x2   :  { %61 = vmatpush.msra.mxu0 %v37_v0 }
   0x4   :  { %62 = vmatpush.msra.mxu0 %v36_v1 }
   0x5   :  { %15 = vsyncpa [#allocation3], 0  ;;  %v34_v3 = vld [vmem:[%s1018_s1] sm:$0xff]  ;;  %vm42_vm0 = vcmask 261120   ;;  %v33_v5 = vld [vmem:[%s1017_s0 + $0x8] sm:$0xff]  ;;  %s752_s1 = smov 64  }
   0x6   :  { %63 = vmatpush.msra.mxu0 %v35_v2  ;;  %v32_v4 = vld [vmem:[%s1017_s0] sm:$0xff]  ;;  %s753_s23 = smov 80   ;;  %s754_s24 = smov 96   ;;  %vm75_vm1 = vcmask 130048   ;;  %vm101_vm2 = vcmask 64512  }
   0x7   :  { %v694_v6 = vld [vmem:[%s1019_s2] ss:$0 sm:$0xff]  ;;  %s755_s25 = smov 112   ;;  %s756_s0 = smov 48  }
   0x8   :  { %64 = vmatpush.msra.mxu0 %v34_v3  ;;  %s757_s2 = smov 16   ;;  %s650_s27 = sshll.u32 %s1025_s8, 4  ;;  %s651_s27 = int_to_ptr.hbm [resolvable:$true] %s650_s27 }
   0x9   :  { %666 = vmatmul.msk.f32.vlgmr.msra.gmra.mxu0 %vm42_vm0, %v32_v4  ;;  %s760_s28 = smov 128   ;;  %s761_s29 = smov 8  }
  0x11   :  { %667 = vmatmul.msk.f32.gmra.mxu0 %vm42_vm0, %v33_v5  ;;  %v423_v5 = vld [vmem:[%s1020_s3 + $0x18] sm:$0xff] }
  0x86   :  { %v66_v7 = vpop.f32.mrf.mxu0 }
  0x87   :  { %v67_v8 = vadd.f32 %v694_v6, %v66_v7  ;;  %v421_v7 = vld [vmem:[%s1020_s3 + $0x8] sm:$0xff] }
  0x89   :  { %126 = vrot.lane.b32.xlu2 %v67_v8, %s752_s1  ;;  %163 = vrot.lane.b32.xlu1 %v67_v8, %s753_s23 }
  0x8a   :  { %73 = vrot.lane.b32.xlu0 %v67_v8, %s754_s24 }
  0x8e   :  { %v69_v9 = vpop.f32.mrf.mxu0 }
  0x8f   :  { %v70_v10 = vadd.f32 %v694_v6, %v69_v9  ;;  %v422_v6 = vld [vmem:[%s1020_s3 + $0x10] sm:$0xff]  ;;  %v420_v9 = vld [vmem:[%s1020_s3] sm:$0xff] }
  0x91   :  { %256 = vrot.lane.b32.xlu2 %v70_v10, %s754_s24  ;;  %161 = vrot.lane.b32.xlu1 %v67_v8, %s755_s25 }
  0x99   :  { %334 = vrot.lane.b32.xlu2 %v70_v10, %s755_s25  ;;  %336 = vrot.lane.b32.xlu1 %v70_v10, %s753_s23 }
  0xa1   :  { %214 = vrot.lane.b32.xlu2 %v67_v8, %s756_s0 }
  0xe3   :  { %v127_v11 = vpop.permute.xlu2 %126 }
  0xeb   :  { %v257_v12 = vpop.permute.xlu2 %256 }
  0xf3   :  { %v335_v13 = vpop.permute.xlu2 %334 }
  0xfb   :  { %v215_v14 = vpop.permute.xlu2 %214  ;;  %v164_v15 = vpop.permute.xlu1 %163 }
  0xfc   :  { %v74_v16 = vpop.permute.xlu0 %73  ;;  %671 = vmatpush.xpose.msk.msra.mxu3 %vm75_vm1, %v164_v15 }
  0xfd   :  { %668 = vmatpush.xpose.msk.msra.mxu1 %vm75_vm1, %v74_v16 }
 0x100   :  { %235 = vmatpush.msrb.mxu3 %v215_v14  ;;  %669 = vmatmul.msk.f32.vlgmr.msra.gmra.mxu1 %vm75_vm1, %v67_v8 }
 0x101   :  { %147 = vmatpush.msrb.mxu1 %v127_v11 }
 0x103   :  { %674 = vmatpush.xpose.msk.msra.mxu1 %vm75_vm1, %v257_v12  ;;  %v162_v17 = vpop.permute.xlu1 %161 }
 0x104   :  { %672 = vmatmul.msk.f32.vlgmr.msra.gmra.mxu3 %vm75_vm1, %v162_v17 }
 0x10b   :  { %v337_v25 = vpop.permute.xlu1 %336 }
 0x17d   :  { %v97_v18 = vpop.f32.mrf.mxu1 }
 0x17e   :  { %v100_v19 = vmul.f32 0.25, %v97_v18 }
 0x180   :  { %v102_v20 = vsel %vm101_vm2, %v100_v19, -inf }
 0x181   :  { %103 = vmax.xlane.f32.xlu0 %v102_v20 }
 0x187   :  { %v186_v21 = vpop.f32.mrf.mxu3 }
 0x188   :  { %v189_v22 = vmul.f32 0.25, %v186_v21 }
 0x18a   :  { %v190_v23 = vsel %vm101_vm2, %v189_v22, -inf }
 0x18b   :  { %191 = vmax.xlane.f32.xlu1 %v190_v23 }
 0x195   :  { %387 = vrot.lane.b32.xlu0 %v70_v10, %s756_s0 }
 0x19d   :  { %307 = vrot.lane.b32.xlu0 %v70_v10, %s752_s1 }
 0x1f4   :  { %v104_v24 = vpop.xlane.xlu0 %103 }
 0x1f5   :  { %v105_v26 = vsub.f32 %v100_v19, %v104_v24 }
 0x1f7   :  { %v106_v27 = vmul.f32 1.442695, %v105_v26 }
 0x1f9   :  { %696 = vpow2.f32 %v106_v27 }
 0x1fe   :  { %v192_v28 = vpop.xlane.xlu1 %191 }
 0x1ff   :  { %v697_v29 = vpop.eup %696  ;;  %v193_v30 = vsub.f32 %v189_v22, %v192_v28 }
 0x200   :  { %670 = vmatmul.msk.f32.vlgmr.msrb.gmra.mxu1 %vm101_vm2, %v697_v29  ;;  %v108_v31 = vsel %vm101_vm2, %v697_v29, 0.0  ;;  %v846_v32 = vmul.f32 %v697_v29, %v105_v26 }
 0x201   :  { %v194_v33 = vmul.f32 1.442695, %v193_v30  ;;  %109 = vadd.xlane.f32.xlu0 %v108_v31  ;;  %677 = vmatpush.xpose.msk.msrb.mxu1 %vm75_vm1, %v337_v25 }
 0x203   :  { %698 = vpow2.f32 %v194_v33 }
 0x207   :  { %v388_v34 = vpop.permute.xlu0 %387 }
 0x208   :  { %675 = vmatmul.msk.f32.vlgmr.msra.gmra.mxu1 %vm75_vm1, %v70_v10 }
 0x209   :  { %v699_v35 = vpop.eup %698  ;;  %408 = vmatpush.msra.mxu1 %v388_v34 }
 0x20a   :  { %673 = vmatmul.msk.f32.vlgmr.msrb.gmra.mxu3 %vm101_vm2, %v699_v35  ;;  %v851_v36 = vmul.f32 %v699_v35, %v193_v30  ;;  %v196_v45 = vsel %vm101_vm2, %v699_v35, 0.0 }
 0x20f   :  { %v308_v37 = vpop.permute.xlu0 %307 }
 0x210   :  { %328 = vmatpush.msra.mxu3 %v308_v37  ;;  %678 = vmatmul.msk.f32.vlgmr.msrb.gmra.mxu1 %vm75_vm1, %v335_v13 }
 0x212   :  { %443 = vmatpush.msrb.mxu3 %v423_v5 }
 0x214   :  { %444 = vmatpush.msrb.mxu3 %v422_v6 }
 0x216   :  { %445 = vmatpush.msrb.mxu3 %v421_v7 }
 0x218   :  { %446 = vmatpush.msrb.mxu3 %v420_v9 }
 0x274   :  { %v883_v8 = vpop.xlane.xlu0 %109 }
 0x275   :  { %v122_v22 = vand.u32 2147483648, %v883_v8  ;;  %vm116_vm10 = vweird.f32 %v883_v8  ;;  %v120_v24 = vand.u32 2147483647, %v883_v8 }
 0x277   :  { %v123_v30 = vor.u32 1.1754944e-38, %v122_v22  ;;  %vm121_vm14 = vcmp.eq.f32.partialorder %v120_v24, 8.507059e+37 }
 0x27d   :  { %v854_v38 = vpop.f32.mrf.mxu1 }
 0x285   :  { %v279_v39 = vpop.f32.mrf.mxu1 }
 0x286   :  { %v282_v40 = vmul.f32 0.25, %v279_v39 }
 0x288   :  { %v283_v41 = vsel %vm101_vm2, %v282_v40, -inf }
 0x289   :  { %284 = vmax.xlane.f32.xlu1 %v283_v41 }
 0x28d   :  { %v359_v42 = vpop.f32.mrf.mxu1  ;;  %v237_v3 = vpop.f32.mrf.mxu3 }
 0x28e   :  { %v362_v43 = vmul.f32 0.25, %v359_v42 }
 0x290   :  { %v363_v44 = vsel %vm101_vm2, %v362_v43, -inf }
 0x291   :  { %364 = vmax.xlane.f32.xlu2 %v363_v44 }
 0x299   :  { %197 = vadd.xlane.f32.xlu2 %v196_v45 }
 0x2fc   :  { %v285_v46 = vpop.xlane.xlu1 %284 }
 0x2fd   :  { %v286_v47 = vsub.f32 %v282_v40, %v285_v46 }
 0x2ff   :  { %v287_v48 = vmul.f32 1.442695, %v286_v47 }
 0x301   :  { %700 = vpow2.f32 %v287_v48 }
 0x304   :  { %v365_v49 = vpop.xlane.xlu2 %364 }
 0x305   :  { %v366_v50 = vsub.f32 %v362_v43, %v365_v49 }
 0x307   :  { %v701_v51 = vpop.eup %700  ;;  %v367_v52 = vmul.f32 1.442695, %v366_v50 }
 0x308   :  { %676 = vmatmul.msk.f32.vlgmr.msra.gmra.mxu3 %vm101_vm2, %v701_v51  ;;  %v289_v53 = vsel %vm101_vm2, %v701_v51, 0.0 }
 0x309   :  { %702 = vpow2.f32 %v367_v52  ;;  %290 = vadd.xlane.f32.xlu2 %v289_v53  ;;  %v905_v53 = vld [vmem:[%s1024_s7] sm:$0xff] }
 0x30c   :  { %v861_v54 = vpop.xlane.xlu2 %197 }
 0x30d   :  { %704 = vrcp.f32 %v861_v54  ;;  %v210_v62 = vand.u32 2147483648, %v861_v54  ;;  %vm204_vm4 = vweird.f32 %v861_v54  ;;  %v208_v63 = vand.u32 2147483647, %v861_v54 }
 0x30e   :  { %706 = vrcp.f32 %v883_v8 }
 0x30f   :  { %v703_v55 = vpop.eup %702  ;;  %v211_v1 = vor.u32 1.1754944e-38, %v210_v62  ;;  %vm209_vm6 = vcmp.eq.f32.partialorder %v208_v63, 8.507059e+37  ;;  %v758_v62 = vmov 32.0   ;;  %v154_v63 = vsel %vm101_vm2, %v846_v32, 0.0 }
 0x310   :  { %679 = vmatmul.msk.f32.vlgmr.msra.gmra.mxu1 %vm101_vm2, %v703_v55  ;;  %v369_v56 = vsel %vm101_vm2, %v703_v55, 0.0  ;;  %v424_v55 = vperm.slane %v905_v53, 0 }
 0x311   :  { %370 = vadd.xlane.f32.xlu1 %v369_v56 }
 0x313   :  { %v705_v57 = vpop.eup %704 }
 0x314   :  { %v200_v58 = vmul.f32 %v705_v57, %v861_v54  ;;  %vm205_vm3 = vweird.f32 %v705_v57  ;;  %v707_v10 = vpop.eup %706 }
 0x315   :  { %vm206_vm5 = vmor %vm204_vm4, %vm205_vm3  ;;  %v112_v12 = vmul.f32 %v707_v10, %v883_v8  ;;  %vm117_vm8 = vweird.f32 %v707_v10 }
 0x316   :  { %v201_v59 = vsub.f32 1.0, %v200_v58  ;;  %vm118_vm12 = vmor %vm116_vm10, %vm117_vm8 }
 0x317   :  { %v113_v13 = vsub.f32 1.0, %v112_v12 }
 0x318   :  { %v202_v60 = vmul.f32 %v705_v57, %v201_v59 }
 0x319   :  { %v114_v16 = vmul.f32 %v707_v10, %v113_v13 }
 0x31a   :  { %v203_v61 = vadd.f32 %v705_v57, %v202_v60 }
 0x31b   :  { %v115_v21 = vadd.f32 %v707_v10, %v114_v16 }
 0x31c   :  { %v207_v0 = vsel %vm206_vm5, %v705_v57, %v203_v61 }
 0x31d   :  { %v870_v2 = vsel %vm209_vm6, %v211_v1, %v207_v0  ;;  %v119_v27 = vsel %vm118_vm12, %v707_v10, %v115_v21 }
 0x31e   :  { %v240_v4 = vmul.f32 %v237_v3, %v870_v2  ;;  %v893_v33 = vsel %vm121_vm14, %v123_v30, %v119_v27  ;;  %v505_v30 = vperm.slane %v905_v53, 1 }
 0x31f   :  { %v152_v34 = vmul.f32 %v854_v38, %v893_v33 }
 0x32a   :  { %250 = vrot.lane.b32.xlu1 %v240_v4, %s757_s2 }
 0x37c   :  { %v291_v39 = vpop.xlane.xlu2 %290 }
 0x37d   :  { %v303_v45 = vand.u32 2147483648, %v291_v39  ;;  %vm297_vm3 = vweird.f32 %v291_v39  ;;  %v301_v46 = vand.u32 2147483647, %v291_v39 }
 0x37f   :  { %v304_v48 = vor.u32 1.1754944e-38, %v303_v45  ;;  %vm302_vm5 = vcmp.eq.f32.partialorder %v301_v46, 8.507059e+37  ;;  %v562_v45 = vld [vmem:[%s1023_s6 + $0x60] sm:$0xff] }
 0x384   :  { %v371_v11 = vpop.xlane.xlu1 %370 }
 0x385   :  { %708 = vrcp.f32 %v371_v11  ;;  %v383_v18 = vand.u32 2147483648, %v371_v11  ;;  %v381_v20 = vand.u32 2147483647, %v371_v11  ;;  %vm377_vm9 = vweird.f32 %v371_v11 }
 0x386   :  { %710 = vrcp.f32 %v291_v39 }
 0x387   :  { %v384_v25 = vor.u32 1.1754944e-38, %v383_v18  ;;  %vm382_vm13 = vcmp.eq.f32.partialorder %v381_v20, 8.507059e+37  ;;  %712 = vrcp.f32 %v758_v62  ;;  %v513_v18 = vld [vmem:[%s1021_s4 + $0x10] sm:$0xff]  ;;  %v511_v20 = vld [vmem:[%s1021_s4] sm:$0xff] }
 0x38b   :  { %v709_v14 = vpop.eup %708  ;;  %v330_v49 = vpop.f32.mrf.mxu3 }
 0x38c   :  { %v373_v15 = vmul.f32 %v709_v14, %v371_v11  ;;  %vm378_vm7 = vweird.f32 %v709_v14  ;;  %v711_v40 = vpop.eup %710 }
 0x38d   :  { %vm379_vm11 = vmor %vm377_vm9, %vm378_vm7  ;;  %v410_v29 = vpop.f32.mrf.mxu1  ;;  %v293_v41 = vmul.f32 %v711_v40, %v291_v39  ;;  %vm298_vm15 = vweird.f32 %v711_v40  ;;  %v713_v0 = vpop.eup %712 }
 0x38e   :  { %v374_v17 = vsub.f32 1.0, %v373_v15  ;;  %vm299_vm4 = vmor %vm297_vm3, %vm298_vm15  ;;  %v461_v1 = vmul.f32 32.0, %v713_v0 }
 0x38f   :  { %v294_v42 = vsub.f32 1.0, %v293_v41  ;;  %v564_v41 = vld [vmem:[%s1023_s6 + $0x70] sm:$0xff] }
 0x390   :  { %v375_v19 = vmul.f32 %v709_v14, %v374_v17  ;;  %v462_v3 = vsub.f32 1.0, %v461_v1  ;;  %v514_v17 = vld [vmem:[%s1021_s4 + $0x18] sm:$0xff] }
 0x391   :  { %v295_v43 = vmul.f32 %v711_v40, %v294_v42  ;;  %537 = vmatpush.msrb.mxu0 %v514_v17  ;;  %v563_v42 = vld [vmem:[%s1023_s6 + $0x68] sm:$0xff] }
 0x392   :  { %v376_v23 = vadd.f32 %v709_v14, %v375_v19  ;;  %v463_v4 = vmul.f32 %v713_v0, %v462_v3  ;;  %v512_v19 = vld [vmem:[%s1021_s4 + $0x8] sm:$0xff] }
 0x393   :  { %v296_v44 = vadd.f32 %v711_v40, %v295_v43  ;;  %538 = vmatpush.msrb.mxu0 %v513_v18 }
 0x394   :  { %v380_v26 = vsel %vm379_vm11, %v709_v14, %v376_v23  ;;  %v464_v5 = vadd.f32 %v713_v0, %v463_v4  ;;  %v552_v4 = vld [vmem:[%s1023_s6 + $0x10] sm:$0xff] }
 0x395   :  { %v385_v28 = vsel %vm382_vm13, %v384_v25, %v380_v26  ;;  %v300_v47 = vsel %vm299_vm4, %v711_v40, %v296_v44  ;;  %539 = vmatpush.msrb.mxu0 %v512_v19  ;;  %v565_v40 = vld [vmem:[%s1023_s6 + $0x78] sm:$0xff] }
 0x396   :  { %v413_v31 = vmul.f32 %v410_v29, %v385_v28  ;;  %v305_v38 = vsel %vm302_vm5, %v304_v48, %v300_v47  ;;  %567 = vmatpush.msra.mxu2 %v565_v40  ;;  %v561_v47 = vld [vmem:[%s1023_s6 + $0x58] sm:$0xff]  ;;  %v560_v48 = vld [vmem:[%s1023_s6 + $0x50] sm:$0xff] }
 0x397   :  { %v333_v50 = vmul.f32 %v330_v49, %v305_v38  ;;  %540 = vmatpush.msrb.mxu0 %v511_v20  ;;  %v559_v38 = vld [vmem:[%s1023_s6 + $0x48] sm:$0xff]  ;;  %v558_v49 = vld [vmem:[%s1023_s6 + $0x40] sm:$0xff] }
 0x398   :  { %415 = vrot.lane.b32.xlu2 %v413_v31, %s757_s2  ;;  %568 = vmatpush.msra.mxu2 %v564_v41 }
 0x39a   :  { %569 = vmatpush.msra.mxu2 %v563_v42 }
 0x39c   :  { %v251_v35 = vpop.permute.xlu1 %250  ;;  %570 = vmatpush.msra.mxu2 %v562_v45 }
 0x39d   :  { %v253_v37 = vsel %vm75_vm1, %v152_v34, %v251_v35  ;;  %v508_v35 = vperm.slane %v905_v53, 2 }
 0x39e   :  { %680 = vmatmul.msk.f32.vlgmr.msrb.gmra.mxu3 %vm42_vm0, %v253_v37  ;;  %571 = vmatpush.msra.mxu2 %v561_v47 }
 0x3a0   :  { %572 = vmatpush.msra.mxu2 %v560_v48 }
 0x3a2   :  { %573 = vmatpush.msra.mxu2 %v559_v38 }
 0x3a4   :  { %574 = vmatpush.msra.mxu2 %v558_v49 }
 0x3f2   :  { %v416_v51 = vpop.permute.xlu2 %415 }
 0x3f3   :  { %v418_v52 = vsel %vm75_vm1, %v333_v50, %v416_v51  ;;  %vm465_vm1 = vweird.f32 %v713_v0  ;;  %v557_v51 = vld [vmem:[%s1023_s6 + $0x38] sm:$0xff] }
 0x3f4   :  { %681 = vmatmul.msk.f32.gmra.mxu3 %vm42_vm0, %v418_v52  ;;  %v912_v6 = vsel %vm465_vm1, %v713_v0, %v464_v5  ;;  %575 = vmatpush.msra.mxu2 %v557_v51  ;;  %v551_v5 = vld [vmem:[%s1023_s6 + $0x8] sm:$0xff] }
 0x421   :  { %v448_v56 = vpop.f32.mrf.mxu3 }
 0x422   :  { %v449_v57 = vadd.f32 %v448_v56, %v424_v55 }
 0x424   :  { %v454_v58 = vsel %vm42_vm0, %v449_v57, 0.0 }
 0x425   :  { %455 = vadd.xlane.f32.xlu1 %v454_v58 }
 0x477   :  { %v451_v59 = vpop.f32.mrf.mxu3 }
 0x478   :  { %v452_v60 = vadd.f32 %v451_v59, %v424_v55  ;;  %v556_v55 = vld [vmem:[%s1023_s6 + $0x30] sm:$0xff]  ;;  %v554_v59 = vld [vmem:[%s1023_s6 + $0x20] sm:$0xff] }
 0x479   :  { %576 = vmatpush.msra.mxu2 %v556_v55 }
 0x47a   :  { %v457_v61 = vsel %vm42_vm0, %v452_v60, 0.0 }
 0x47b   :  { %458 = vadd.xlane.f32.xlu2 %v457_v61  ;;  %v553_v61 = vld [vmem:[%s1023_s6 + $0x18] sm:$0xff] }
 0x483   :  { %155 = vadd.xlane.f32.xlu2 %v154_v63 }
 0x498   :  { %v456_v7 = vpop.xlane.xlu1 %455 }
 0x499   :  { %v467_v9 = vmul.f32 %v912_v6, %v456_v7  ;;  %v550_v7 = vld [vmem:[%s1023_s6] sm:$0xff] }
 0x49b   :  { %v469_v10 = vsub.f32 %v449_v57, %v467_v9  ;;  %v555_v57 = vld [vmem:[%s1023_s6 + $0x28] sm:$0xff]  ;;  %v695_v9 = vld [vmem:[%s1022_s5] ss:$0 sm:$0xff] }
 0x49c   :  { %577 = vmatpush.msra.mxu2 %v555_v57 }
 0x49d   :  { %v471_v11 = vmul.f32 %v469_v10, %v469_v10 }
 0x49e   :  { %578 = vmatpush.msra.mxu2 %v554_v59 }
 0x49f   :  { %v473_v12 = vsel %vm42_vm0, %v471_v11, 0.0 }
 0x4a0   :  { %474 = vadd.xlane.f32.xlu0 %v473_v12  ;;  %579 = vmatpush.msra.mxu2 %v553_v61 }
 0x4a2   :  { %580 = vmatpush.msra.mxu2 %v552_v4 }
 0x4a4   :  { %581 = vmatpush.msra.mxu2 %v551_v5 }
 0x4a6   :  { %582 = vmatpush.msra.mxu2 %v550_v7 }
 0x4ee   :  { %v459_v13 = vpop.xlane.xlu2 %458 }
 0x4ef   :  { %v468_v32 = vmul.f32 %v912_v6, %v459_v13 }
 0x4f1   :  { %v917_v14 = vsub.f32 %v452_v60, %v468_v32 }
 0x4f3   :  { %v472_v15 = vmul.f32 %v917_v14, %v917_v14 }
 0x4f5   :  { %v476_v16 = vsel %vm42_vm0, %v472_v15, 0.0  ;;  %v566_v15 = vperm.slane %v905_v53, 3 }
 0x4f6   :  { %477 = vadd.xlane.f32.xlu0 %v476_v16  ;;  %v156_v40 = vpop.xlane.xlu2 %155 }
 0x4f7   :  { %v159_v42 = vmul.f32 %v156_v40, %v893_v33 }
 0x513   :  { %v475_v21 = vpop.xlane.xlu0 %474 }
 0x514   :  { %v479_v22 = vmul.f32 %v475_v21, %v912_v6 }
 0x516   :  { %v481_v23 = vadd.f32 1e-05, %v479_v22 }
 0x518   :  { %714 = vrsqrt.f32 %v481_v23  ;;  %vm489_vm7 = vweird.f32 %v481_v23 }
 0x51e   :  { %v715_v24 = vpop.eup %714 }
 0x51f   :  { %v484_v25 = vmul.f32 %v715_v24, %v481_v23  ;;  %vm490_vm6 = vweird.f32 %v715_v24 }
 0x520   :  { %vm491_vm8 = vmor %vm489_vm7, %vm490_vm6 }
 0x521   :  { %v485_v26 = vmul.f32 %v715_v24, %v484_v25 }
 0x523   :  { %v486_v27 = vmul.f32 0.5, %v485_v26 }
 0x525   :  { %v487_v28 = vsub.f32 1.5, %v486_v27  ;;  %v242_v27 = vsel %vm101_vm2, %v851_v36, 0.0  ;;  %vm642_vm2 = vcmask 7168  }
 0x527   :  { %v488_v29 = vmul.f32 %v715_v24, %v487_v28 }
 0x529   :  { %v492_v31 = vsel %vm491_vm8, %v715_v24, %v488_v29 }
 0x52a   :  { %v503_v34 = vmul.f32 %v492_v31, %v469_v10 }
 0x52c   :  { %v506_v37 = vmul.f32 %v505_v30, %v503_v34 }
 0x52e   :  { %v509_v39 = vadd.f32 %v508_v35, %v506_v37 }
 0x530   :  { %682 = vmatmul.msk.f32.vlgmr.msrb.gmra.mxu0 %vm42_vm0, %v509_v39 }
 0x569   :  { %v478_v43 = vpop.xlane.xlu0 %477 }
 0x56a   :  { %v480_v44 = vmul.f32 %v478_v43, %v912_v6 }
 0x56c   :  { %v482_v46 = vadd.f32 1e-05, %v480_v44 }
 0x56e   :  { %716 = vrsqrt.f32 %v482_v46  ;;  %vm499_vm10 = vweird.f32 %v482_v46 }
 0x56f   :  { %718 = vlog2.f32 %v883_v8 }
 0x570   :  { %720 = vlog2.f32 %v861_v54 }
 0x574   :  { %v717_v50 = vpop.eup %716 }
 0x575   :  { %v494_v52 = vmul.f32 %v717_v50, %v482_v46  ;;  %vm500_vm9 = vweird.f32 %v717_v50  ;;  %v719_v41 = vpop.eup %718 }
 0x576   :  { %vm501_vm11 = vmor %vm499_vm10, %vm500_vm9  ;;  %v721_v36 = vpop.eup %720  ;;  %v158_v44 = vmul.f32 0.6931472, %v719_v41 }
 0x577   :  { %v495_v56 = vmul.f32 %v717_v50, %v494_v52  ;;  %v246_v45 = vmul.f32 0.6931472, %v721_v36  ;;  %v634_v52 = vperm.slane %v905_v53, 4 }
 0x578   :  { %v160_v48 = vsub.f32 %v158_v44, %v159_v42 }
 0x579   :  { %v496_v58 = vmul.f32 0.5, %v495_v56  ;;  %v637_v56 = vperm.slane %v905_v53, 5 }
 0x57b   :  { %v497_v60 = vsub.f32 1.5, %v496_v58 }
 0x57d   :  { %v498_v62 = vmul.f32 %v717_v50, %v497_v60 }
 0x57f   :  { %v502_v63 = vsel %vm501_vm11, %v717_v50, %v498_v62 }
 0x580   :  { %v504_v0 = vmul.f32 %v502_v63, %v917_v14 }
 0x582   :  { %v507_v1 = vmul.f32 %v505_v30, %v504_v0 }
 0x584   :  { %v510_v3 = vadd.f32 %v508_v35, %v507_v1 }
 0x586   :  { %683 = vmatmul.msk.f32.gmra.mxu0 %vm42_vm0, %v510_v3 }
 0x5ad   :  { %v542_v10 = vpop.f32.mrf.mxu0 }
 0x5ae   :  { %v543_v11 = vadd.f32 %v695_v9, %v542_v10 }
 0x5b0   :  { %v548_v12 = vmax.f32 %v543_v11, 0.0 }
 0x5b2   :  { %583 = vmatmul.f32.vlgmr.msra.gmra.mxu2 %v548_v12 }
 0x603   :  { %v545_v13 = vpop.f32.mrf.mxu0 }
 0x604   :  { %v546_v32 = vadd.f32 %v695_v9, %v545_v13 }
 0x606   :  { %v549_v14 = vmax.f32 %v546_v32, 0.0 }
 0x608   :  { %586 = vmatmul.f32.gmra.mxu2 %v549_v14 }
 0x635   :  { %v584_v16 = vpop.f32.mrf.mxu2 }
 0x636   :  { %v585_v17 = vadd.f32 %v584_v16, %v566_v15 }
 0x638   :  { %v590_v18 = vsel %vm42_vm0, %v585_v17, 0.0 }
 0x639   :  { %591 = vadd.xlane.f32.xlu0 %v590_v18 }
 0x68b   :  { %v587_v19 = vpop.f32.mrf.mxu2 }
 0x68c   :  { %v588_v20 = vadd.f32 %v587_v19, %v566_v15 }
 0x68e   :  { %v593_v21 = vsel %vm42_vm0, %v588_v20, 0.0 }
 0x68f   :  { %594 = vadd.xlane.f32.xlu0 %v593_v21 }
 0x6ac   :  { %v592_v22 = vpop.xlane.xlu0 %591 }
 0x6ad   :  { %v596_v23 = vmul.f32 %v592_v22, %v912_v6 }
 0x6af   :  { %v598_v24 = vsub.f32 %v585_v17, %v596_v23 }
 0x6b1   :  { %v600_v25 = vmul.f32 %v598_v24, %v598_v24 }
 0x6b3   :  { %v602_v26 = vsel %vm42_vm0, %v600_v25, 0.0 }
 0x6b4   :  { %603 = vadd.xlane.f32.xlu1 %v602_v26 }
 0x6bc   :  { %243 = vadd.xlane.f32.xlu1 %v242_v27 }
 0x702   :  { %v595_v28 = vpop.xlane.xlu0 %594 }
 0x703   :  { %v597_v29 = vmul.f32 %v595_v28, %v912_v6 }
 0x705   :  { %v599_v30 = vsub.f32 %v588_v20, %v597_v29 }
 0x707   :  { %v601_v31 = vmul.f32 %v599_v30, %v599_v30 }
 0x709   :  { %v605_v34 = vsel %vm42_vm0, %v601_v31, 0.0 }
 0x70a   :  { %606 = vadd.xlane.f32.xlu0 %v605_v34 }
 0x727   :  { %v604_v35 = vpop.xlane.xlu1 %603 }
 0x728   :  { %v608_v37 = vmul.f32 %v604_v35, %v912_v6 }
 0x72a   :  { %v610_v39 = vadd.f32 1e-05, %v608_v37 }
 0x72c   :  { %722 = vrsqrt.f32 %v610_v39  ;;  %vm618_vm13 = vweird.f32 %v610_v39 }
 0x72f   :  { %v244_v43 = vpop.xlane.xlu1 %243 }
 0x730   :  { %v247_v46 = vmul.f32 %v244_v43, %v870_v2 }
 0x732   :  { %v723_v47 = vpop.eup %722  ;;  %v248_v8 = vsub.f32 %v246_v45, %v247_v46 }
 0x733   :  { %v613_v38 = vmul.f32 %v723_v47, %v610_v39  ;;  %vm619_vm12 = vweird.f32 %v723_v47 }
 0x734   :  { %v254_v54 = vmax.f32 %v160_v48, %v248_v8  ;;  %vm620_vm14 = vmor %vm618_vm13, %vm619_vm12 }
 0x735   :  { %v614_v49 = vmul.f32 %v723_v47, %v613_v38 }
 0x736   :  { %643 = vst.msk [vmem:[%s1026_s9] sm:$0xff] %vm642_vm2, %v254_v54  ;;  %s759_s9 = smov [#allocation2]  }
 0x737   :  { %v615_v50 = vmul.f32 0.5, %v614_v49  ;;  %s648_s0 = sshll.u32 %s759_s9, 4  ;;  %s649_s0 = int_to_ptr.vmem [resolvable:$true] %s648_s0 }
 0x739   :  { %v616_v51 = vsub.f32 1.5, %v615_v50 }
 0x73b   :  { %v617_v33 = vmul.f32 %v723_v47, %v616_v51 }
 0x73d   :  { %v621_v2 = vsel %vm620_vm14, %v723_v47, %v617_v33 }
 0x73e   :  { %v632_v55 = vmul.f32 %v621_v2, %v598_v24 }
 0x740   :  { %v635_v57 = vmul.f32 %v634_v52, %v632_v55 }
 0x742   :  { %v638_v58 = vadd.f32 %v637_v56, %v635_v57 }
 0x744   :  { %640 = vst.msk [vmem:[#allocation2] sm:$0xff] %vm42_vm0, %v638_v58 }
 0x77d   :  { %v607_v59 = vpop.xlane.xlu0 %606 }
 0x77e   :  { %v609_v60 = vmul.f32 %v607_v59, %v912_v6 }
 0x780   :  { %v611_v61 = vadd.f32 1e-05, %v609_v60 }
 0x782   :  { %724 = vrsqrt.f32 %v611_v61  ;;  %vm628_vm3 = vweird.f32 %v611_v61 }
 0x788   :  { %v725_v62 = vpop.eup %724 }
 0x789   :  { %v623_v63 = vmul.f32 %v725_v62, %v611_v61  ;;  %vm629_vm15 = vweird.f32 %v725_v62 }
 0x78a   :  { %vm630_vm4 = vmor %vm628_vm3, %vm629_vm15 }
 0x78b   :  { %v624_v0 = vmul.f32 %v725_v62, %v623_v63 }
 0x78d   :  { %v625_v1 = vmul.f32 0.5, %v624_v0 }
 0x78f   :  { %v626_v3 = vsub.f32 1.5, %v625_v1 }
 0x791   :  { %v627_v4 = vmul.f32 %v725_v62, %v626_v3 }
 0x793   :  { %v631_v5 = vsel %vm630_vm4, %v725_v62, %v627_v4 }
 0x794   :  { %v633_v53 = vmul.f32 %v631_v5, %v599_v30 }
 0x796   :  { %v636_v6 = vmul.f32 %v634_v52, %v633_v53 }
 0x798   :  { %v639_v7 = vadd.f32 %v637_v56, %v636_v6 }
 0x79a   :  { %641 = vst.msk [vmem:[#allocation2 + $0x8] sm:$0xff] %vm42_vm0, %v639_v7 }
 0x79b   :  { %656 = dma.vmem_to_hbm [thread:$0]  %s649_s0, 256, %s651_s27, [#allocation3], %s760_s28, %s760_s28, %s761_s29  }
 0x79c   :  { %750 = dma.done.wait [#allocation3], 256  }
 0x79d   :  { %751 = vsyncadd [#allocation3], 4294967040 }
 0x79e   :  { %665 = vsyncpa [#allocation3], 1 }

</bundles_post_ra>
